<compile_context>
chip_gen: v7x
topology: tpu7x:2x2x1
jax: 0.10.0
libtpu: 0.0.40
codegen_flags: <defaults>
</compile_context>

<pallas_src>
import jax
import jax.numpy as jnp
from jax import lax
from jax.experimental import pallas as pl
from jax.experimental.pallas import tpu as pltpu

_EPS = 1e-12  # matches torch.nn.functional.normalize default eps


def _soft_router_kernel(q_ref, x_ref, o_ref):
    # q_ref: VMEM (S, D)   -- pre-normalized, pre-scaled query (resident)
    # x_ref: VMEM (TN, D)  -- one token tile of one batch element, native dtype
    # o_ref: VMEM (S, TN)  -- routing-logits tile
    x = x_ref[...]                                         # (TN, D)
    q = q_ref[...]                                         # (S, D), same dtype

    # Raw logits on the MXU, contracting D on both operands (no key transpose,
    # native-dtype feed, f32 accumulation).
    raw = lax.dot_general(
        q, x,
        dimension_numbers=(((1,), (1,)), ((), ())),
        preferred_element_type=jnp.float32,
    )                                                      # (S, TN) f32

    # Per-token ||x||^2 as a lane-dense row, also via the MXU (ones @ (x*x)^T),
    # with the squares in f32 so normalization keeps full precision even when
    # the main matmul is fed bf16.  8 identical rows keep the operand
    # sublane-aligned; only row 0 is used.
    xf = x.astype(jnp.float32)
    d = xf.shape[-1]
    ssq8 = lax.dot_general(
        jnp.ones((8, d), jnp.float32), xf * xf,
        dimension_numbers=(((1,), (1,)), ((), ())),
        preferred_element_type=jnp.float32,
    )                                                      # (8, TN)
    ssq = ssq8[0:1, :]                                     # (1, TN)

    # key = x / max(||x||, eps)  ==>  logits = raw * rsqrt(max(||x||^2, eps^2))
    inv = lax.rsqrt(jnp.maximum(ssq, _EPS * _EPS))         # (1, TN), EUP
    o_ref[...] = (raw * inv).astype(o_ref.dtype)           # sublane broadcast


def _round_up(n, m):
    return ((n + m - 1) // m) * m


def _pick_token_tile(n_pad, d, x_itemsize, s, out_itemsize):
    """Lane-aligned token tile: big enough to hide per-step overhead, small
    enough that double-buffered tiles stay inside the scoped VMEM budget."""
    vmem_budget = 20 * 1024 * 1024     # headroom under the 32 MiB scoped limit
    target_dma = 512 * 1024            # ~512 KB per-step x DMA

    def vmem_need(tn):
        # double-buffered x tile + double-buffered out tile + resident query
        return 2 * (tn * d * x_itemsize + s * tn * out_itemsize) + s * d * 4

    candidates = [c for c in (2048, 1024, 512, 256, 128) if n_pad % c == 0]
    fitting = [c for c in candidates if vmem_need(c) <= vmem_budget]
    if not fitting:
        return 128 if n_pad % 128 == 0 else n_pad   # extreme-D corner case
    # smallest fitting tile that reaches the DMA target, else largest fitting
    for c in sorted(fitting):
        if c * d * x_itemsize >= target_dma:
            return c
    return max(fitting)


def soft_router_forward(x, weight, scale, *, out_dtype=None):
    """x: (B, N, D); weight: (S, D); scale: scalar. Returns (B, S, N) logits."""
    B, N, D = x.shape
    S, Dw = weight.shape
    assert D == Dw

    if out_dtype is None:
        out_dtype = jnp.promote_types(x.dtype, weight.dtype)
    compute_dtype = x.dtype

    # query = scale * normalize(weight): hoisted, computed once in f32, cast
    # once to the compute dtype (MXU feed), resident across all grid steps.
    w = weight.astype(jnp.float32)
    w_sumsq = jnp.sum(w * w, axis=-1, keepdims=True)
    query = (jnp.asarray(scale, jnp.float32) * w) * lax.rsqrt(
        jnp.maximum(w_sumsq, _EPS * _EPS))                 # (S, D) f32
    query = query.astype(compute_dtype)

    # Lane-align the token axis for (8,128) tiles and unmasked stores.
    if N >= 128 and N % 128 != 0:
        n_pad = _round_up(N, 128)
        x_p = jnp.pad(x, ((0, 0), (0, n_pad - N), (0, 0)))  # zero tokens are safe
    else:
        n_pad = N
        x_p = x

    if n_pad % 128 == 0:
        TN = _pick_token_tile(n_pad, D, x_p.dtype.itemsize, S,
                              jnp.dtype(out_dtype).itemsize)
    else:
        TN = n_pad   # N < 128: single full-N block (block dim == full array dim)
    n_tiles = n_pad // TN

    # TODO(synk): for very small B * n_tiles (< 4) on v7x, flattening (B, N)
    # into one token axis would feed both TensorCores better; skipped here to
    # keep the output (B, S, N) lane-dense without a post-transpose.
    out = pl.pallas_call(
        _soft_router_kernel,
        out_shape=jax.ShapeDtypeStruct((B, S, n_pad), out_dtype),
        grid_spec=pltpu.PrefetchScalarGridSpec(
            num_scalar_prefetch=0,
            grid=(B, n_tiles),
            in_specs=[
                pl.BlockSpec((S, D), lambda b, n: (0, 0)),        # query (resident)
                pl.BlockSpec((None, TN, D), lambda b, n: (b, n, 0)),  # x tile
            ],
            out_specs=pl.BlockSpec((None, S, TN), lambda b, n: (b, 0, n)),
        ),
        compiler_params=pltpu.CompilerParams(
            dimension_semantics=("parallel", "parallel"),
            vmem_limit_bytes=32 * 1024 * 1024),
    )(query, x_p)

    if n_pad != N:
        out = out[:, :, :N]
    return out


def soft_router_ref(x, weight, scale):
    """Pure-JAX reference of the PyTorch forward (eval mode), f32 math."""
    xf = x.astype(jnp.float32)
    wf = weight.astype(jnp.float32)
    key = xf / jnp.maximum(jnp.linalg.norm(xf, axis=-1, keepdims=True), _EPS)
    query = scale * (wf / jnp.maximum(
        jnp.linalg.norm(wf, axis=-1, keepdims=True), _EPS))
    return jnp.einsum("sd,bnd->bsn", query, key,
                      precision=lax.Precision.HIGHEST)


if __name__ == "__main__":
    # Small shapes consistent with the module: batch=2, tokens=16, dim=32, slots=8
    B, N, D, S = 2, 16, 32, 8

    k0, k1 = jax.random.split(jax.random.PRNGKey(0))
    x = jax.random.normal(k0, (B, N, D), dtype=jnp.float32)

    # Deterministic parameter init mirroring reset_parameters():
    #   weight ~ trunc_normal(std=0.02), scale = 1.0
    weight = 0.02 * jax.random.truncated_normal(
        k1, -2.0, 2.0, (S, D), dtype=jnp.float32)
    scale = jnp.float32(1.0)

    out = soft_router_forward(x, weight, scale)
    out = jax.block_until_ready(out)

    ref = soft_router_ref(x, weight, scale)
    assert out.shape == (B, S, N)
    # Tolerance covers possible MXU precision-mode differences between the
    # in-kernel matmul and the XLA reference; logits are bounded by |scale|=1,
    # so this still catches any structural/normalization error.
    max_err = float(jnp.max(jnp.abs(out - ref)))
    assert max_err < 5e-3, f"mismatch vs reference: max abs err {max_err}"

    # TODO(synk): training-mode gaussian noise (noise_std > 0) not implemented;
    # eval-mode forward only.
    print("KERNEL_OK")
</pallas_src>

<mosaic_0001>
module attributes {stable_mosaic.version = 11 : i64} {
  func.func @_soft_router_kernel(%arg0: i32, %arg1: i32, %arg2: memref<8x32xf32, #tpu.memory_space<vmem>>, %arg3: memref<1x16x32xf32, #tpu.memory_space<vmem>>, %arg4: memref<1x8x16xf32, #tpu.memory_space<vmem>>) attributes {dimension_semantics = [#tpu.dimension_semantics<parallel>, #tpu.dimension_semantics<parallel>], iteration_bounds = array<i64: 2, 1>, scalar_prefetch = 0 : i64, scratch_operands = 0 : i64, tpu.core_type = #tpu.core_type<tc>, window_params = [{pipeline_mode = #tpu.pipeline_mode<synchronous>, transform_indices = @transform_0, window_bounds = array<i64: 8, 32>}, {transform_indices = @transform_1, window_bounds = array<i64: 1, 16, 32>}, {transform_indices = @transform_2, window_bounds = array<i64: 1, 8, 16>}]} {
    %c0 = arith.constant 0 : index
    %c0_0 = arith.constant 0 : index
    %c0_1 = arith.constant 0 : index
    %0 = vector.load %arg3[%c0, %c0_0, %c0_1] : memref<1x16x32xf32, #tpu.memory_space<vmem>>, vector<1x16x32xf32>
    %1 = vector.shape_cast %0 : vector<1x16x32xf32> to vector<16x32xf32>
    %c0_2 = arith.constant 0 : index
    %c0_3 = arith.constant 0 : index
    %2 = vector.load %arg2[%c0_2, %c0_3] : memref<8x32xf32, #tpu.memory_space<vmem>>, vector<8x32xf32>
    %cst = arith.constant dense<0.000000e+00> : vector<8x16xf32>
    %3 = tpu.matmul %2, %1, %cst {dimension_numbers = #tpu.dot_dimension_numbers<[1], [1], [0], [0], [0, 0, 1, 0], [], []>} : vector<8x32xf32>, vector<16x32xf32>, vector<8x16xf32> -> vector<8x16xf32>
    %cst_4 = arith.constant 1.000000e+00 : f32
    %4 = vector.broadcast %cst_4 : f32 to vector<8x32xf32>
    %5 = arith.mulf %1, %1 : vector<16x32xf32>
    %cst_5 = arith.constant dense<0.000000e+00> : vector<8x16xf32>
    %6 = tpu.matmul %4, %5, %cst_5 {dimension_numbers = #tpu.dot_dimension_numbers<[1], [1], [0], [0], [0, 0, 1, 0], [], []>} : vector<8x32xf32>, vector<16x32xf32>, vector<8x16xf32> -> vector<8x16xf32>
    %7 = vector.extract_strided_slice %6 {offsets = [0, 0], sizes = [1, 16], strides = [1, 1]} : vector<8x16xf32> to vector<1x16xf32>
    %cst_6 = arith.constant 1.000000e-24 : f32
    %8 = vector.broadcast %cst_6 : f32 to vector<1x16xf32>
    %9 = arith.maximumf %7, %8 : vector<1x16xf32>
    %10 = math.rsqrt %9 : vector<1x16xf32>
    %11 = vector.broadcast %10 : vector<1x16xf32> to vector<8x16xf32>
    %12 = arith.mulf %3, %11 : vector<8x16xf32>
    %c0_7 = arith.constant 0 : index
    %c0_8 = arith.constant 0 : index
    %c0_9 = arith.constant 0 : index
    %13 = vector.load %arg4[%c0_7, %c0_8, %c0_9] : memref<1x8x16xf32, #tpu.memory_space<vmem>>, vector<1x8x16xf32>
    %14 = vector.shape_cast %13 : vector<1x8x16xf32> to vector<8x16xf32>
    %15 = vector.shape_cast %12 : vector<8x16xf32> to vector<1x8x16xf32>
    tpu.vector_store %arg4[%c0_7, %c0_8, %c0_9], %15 {strides = array<i32>} : memref<1x8x16xf32, #tpu.memory_space<vmem>>, vector<1x8x16xf32>,
    return
  }
  func.func @transform_0(%arg0: i32, %arg1: i32) -> (i32, i32) {
    %c0_i32 = arith.constant 0 : i32
    %c0_i32_0 = arith.constant 0 : i32
    %c0_i32_1 = arith.constant 0 : i32
    return %c0_i32, %c0_i32_0 : i32, i32
  }
  func.func @transform_1(%arg0: i32, %arg1: i32) -> (i32, i32, i32) {
    %c0_i32 = arith.constant 0 : i32
    %c0_i32_0 = arith.constant 0 : i32
    return %arg0, %arg1, %c0_i32 : i32, i32, i32
  }
  func.func @transform_2(%arg0: i32, %arg1: i32) -> (i32, i32, i32) {
    %c0_i32 = arith.constant 0 : i32
    %c0_i32_0 = arith.constant 0 : i32
    return %arg0, %c0_i32, %arg1 : i32, i32, i32
  }
}

</mosaic_0001>

<bundles_post_ra>
// kernel: tpu_custom_call.1
= control target key start
LH: loop header
LB: loop body
LE: loop exit
PB: predicated region body
PF: predicated region fallthrough
CT: control target
= control target key end

     0   :  { %7 = vsyncpa [#allocation3], 0  ;;  %s998_s0 = inlined_call_operand.hbm [shape: f32[8,32], index: 0, kind: input, shape index: {}]   ;;  %s999_s1 = inlined_call_operand.hbm [shape: f32[2,16,32], index: 1, kind: input, shape index: {}]   ;;  %s1000_s2 = inlined_call_operand.hbm [shape: f32[2,8,16], index: 2, kind: output, shape index: {}]  }
   0x1   :  { %8 = vsyncpa [#allocation6], 0 }
   0x2   :  { %10 = vsyncpa [#allocation6 + $0x1], 0 }
   0x3   :  { %11 = vsyncpa [#allocation4], 0 }
   0x4   :  { %13 = vsyncpa [#allocation4 + $0x1], 0  ;;  %s778_s9 = smov 0   ;;  %s780_s10 = smov 0  }
   0x5   :  { %s782_s11 = smov 0   ;;  %s784_s12 = smov 0  }
   0x6   :  { %s786_s13 = smov 0   ;;  %s788_s14 = smov 0  }
   0x7 LB: > { %s476_s15 = sadd.s32 4294967295, %s752_s14   ;;  %s477_s16 = sadd.s32 4294967294, %s752_s14   ;;  %s752_s14 = sphi %s788_s14, %s19_s14   ;;  %s748_s13 = sphi %s786_s13, %s1028_s13   ;;  %s744_s12 = sphi %s784_s12, %s1027_s12   ;;  %s740_s11 = sphi %s782_s11, %s1026_s11   ;;  %s736_s10 = sphi %s780_s10, %s1025_s10   ;;  %s732_s9 = sphi %s778_s9, %s1024_s9  }
   0x8   : > { %s61_s17 = sadd.s32 1, %s740_s11  ;;  %p68_p0 = scmp.ne.s32.totalorder %s740_s11, %s736_s10 }
   0x9   : > { %p69_p1 = scmp.eq.s32.totalorder %s752_s14, 0  ;;  %p74_p2 = scmp.ne.s32.totalorder %s736_s10, %s732_s9 }
   0xa   : > { %p816_p3 = scmp.eq.s32.totalorder %s476_s15, 0  ;;  %p100_p4 = scmp.eq.s32.totalorder %s476_s15, 1 }
   0xb   : > { %p820_p5 = por %p69_p1, %p68_p0  ;;  %p106_p6 = scmp.eq.s32.totalorder %s477_s16, 1 }
   0xc   : > { %s1007_s18 = scalar_select %p816_p3, 1, 0 }
   0xd   : > { %p826_p7 = por %p816_p3, %p74_p2  ;;  %p830_p8 = por %p100_p4, %p68_p0 }
   0xe   : > { %p834_p9 = por %p106_p6, %p74_p2  ;;  %p478_p10 = scmp.ge.s32.totalorder %s752_s14, 1 }
   0xf   : > { %s1009_s20 = scalar_select %p826_p7, 1, 0 }
  0x10   : > { %s1010_s21 = scalar_select %p830_p8, 1, 0 }
  0x11   : > { %s1011_s22 = scalar_select %p834_p9, 1, 0 }
  0x12   : > { %p113_p11 = scmp.lt.s32.totalorder %s752_s14, 3  ;;  %s754_s24 = smov [#allocation2]  }
  0x13   : > { %s126_s25 = sshll.u32 %s754_s24, 4  ;;  %p548_p1 = scmp.lt.s32.totalorder %s752_s14, 2  ;;  %s127_s25 = int_to_ptr.vmem [resolvable:$true] %s126_s25 }
  0x14   : > { %p841_p13 = pnand %p478_p10, %p113_p11  ;;  %s31_s28 = sadd.s32 1, %s748_s13 }
  0x15   : > { %p850_p4 = pnand %p548_p1, %p820_p5  ;;  %p861_p6 = scmp.ge.s32.totalorder %s31_s28, 2 }
  0x16   : > { %s1012_s23 = scalar_select %p841_p13, 1, 0 }
  0x17   : > { %p535_p0 = pneg %p841_p13  ;;  %s137_s30 = sand.u32 1, %s740_s11  }
  0x18   : > { %s1013_s26 = scalar_select %p850_p4, 1, 0 }
  0x19   : > { %p856_p2 = pnand %p535_p0, %p816_p3  ;;  %s608_s5 = scalar_lea.hbm %s998_s0, 128 }
  0x1a   : > { %s1015_s29 = scalar_select %p861_p6, 1, 0 }
  0x1b   : > { %p609_p5 = scmp.ne.s32.totalorder %s998_s0, %s608_s5  ;;  %p610_p10 = pneg %p856_p2 }
  0x1c   : > { %p615_p0 = scmp.lt.u32.totalorder %s608_s5, %s998_s0 }
  0x1d   : > { %p611_p11 = pnand %p610_p10, %p609_p5 }
  0x1f   : > { %p612_p1 = pneg %p611_p11 }
  0x21   : > { %p617_p12 = pnand %p615_p0, %p612_p1 }
  0x23   : > { %620 = shalt.err (!%p617_p12)
}
  0x24   : > { %s621_s16 = scalar_lea.vmem %s127_s25, 128  ;;  %p629_p3 = scmp.lt.s32.totalorder %s127_s25, %s127_s25 }
  0x25   : > { %p622_p9 = scmp.ne.s32.totalorder %s127_s25, %s621_s16  ;;  %p630_p13 = scmp.lt.s32.totalorder %s621_s16, %s621_s16 }
  0x27   : > { %p624_p8 = pnand %p622_p9, %p610_p10  ;;  %p631_p4 = por %p630_p13, %p629_p3 }
  0x29   : > { %p625_p7 = pneg %p624_p8 }
  0x2b   : > { %p632_p6 = pnand %p631_p4, %p625_p7 }
  0x2d   : > { %635 = shalt.err (!%p632_p6)
}
  0x2e   : > { %538 = dma.hbm_to_vmem [thread:$0]  (!%p856_p2), %s998_s0, 128, %s127_s25, [#allocation3]  }
  0x2f   : > { %p1016_p9 = scmp.ne.s32.totalorder %s1015_s29, 0  ;;  %s481_s3 = sshll.u32 %s137_s30, 4 }
  0x30   : > { %s498_s5 = sshll.u32 %s748_s13, 8  ;;  %s141_s8 = scalar_lea.vmem [#allocation5], %s481_s3 }
  0x31   : > { %s1030_s28 = smov (%p1016_p9, %s31_s28), 0  ;;  %s892_s7 = scalar_lea.hbm %s999_s1, %s498_s5 }
  0x32   : > { %s56_s4 = ssub.s32 %s748_s13, %s1030_s28  ;;  %s150_s15 = sshll.u32 %s141_s8, 4  ;;  %s899_s15 = int_to_ptr.vmem [resolvable:$true] %s150_s15 }
  0x33   : > { %p59_p3 = scmp.eq.s32.totalorder %s56_s4, 0  ;;  %s901_s29 = scalar_lea.sflag [#allocation6], %s137_s30 }
  0x34   : > { %s636_s16 = scalar_lea.hbm %s892_s7, 256  ;;  %p1017_p8 = scmp.ne.s32.totalorder %s1013_s26, 0 }
  0x35   : > { %s897_s25 = scalar_select %p59_p3, %s740_s11, %s61_s17  }
  0x36   : > { %p637_p7 = scmp.ne.s32.totalorder %s892_s7, %s636_s16  ;;  %p638_p12 = pneg %p1017_p8 }
  0x37   : > { %s641_s3 = scalar_lea.hbm %s999_s1, 512  ;;  %p642_p2 = scmp.lt.u32.totalorder %s892_s7, %s999_s1 }
  0x38   : > { %p639_p13 = pnand %p638_p12, %p637_p7  ;;  %p643_p6 = scmp.lt.u32.totalorder %s641_s3, %s636_s16 }
  0x39   : > { %p645_p10 = scmp.lt.u32.totalorder %s636_s16, %s892_s7 }
  0x3a   : > { %p640_p4 = pneg %p639_p13  ;;  %p644_p5 = por %p643_p6, %p642_p2 }
  0x3c   : > { %p646_p11 = por %p645_p10, %p644_p5 }
  0x3e   : > { %p647_p1 = pnand %p646_p11, %p640_p4 }
  0x40   : > { %650 = shalt.err (!%p647_p1)
}
  0x41   : > { %s651_s17 = scalar_lea.vmem %s899_s15, 256  ;;  %s755_s30 = smov [#allocation5]  }
  0x42   : > { %p652_p0 = scmp.ne.s32.totalorder %s899_s15, %s651_s17  ;;  %s656_s27 = sshll.u32 %s755_s30, 4  ;;  %s657_s27 = int_to_ptr.vmem [resolvable:$false] %s656_s27 }
  0x43   : > { %s658_s6 = scalar_lea.vmem %s657_s27, 512  ;;  %p659_p7 = scmp.lt.s32.totalorder %s899_s15, %s657_s27 }
  0x44   : > { %p654_p9 = pnand %p652_p0, %p638_p12  ;;  %p660_p13 = scmp.lt.s32.totalorder %s658_s6, %s651_s17 }
  0x46   : > { %p655_p3 = pneg %p654_p9  ;;  %p661_p2 = por %p660_p13, %p659_p7 }
  0x48   : > { %p662_p6 = pnand %p661_p2, %p655_p3 }
  0x4a   : > { %665 = shalt.err (!%p662_p6)
}
  0x4b   : > { %s756_s8 = smov 128   ;;  %s757_s16 = smov 8  }
  0x4c   : > { %542 = dma.hbm_to_vmem [thread:$0]  (!%p1017_p8), %s892_s7, 256, %s899_s15, %s901_s29, %s756_s8, %s756_s8, %s757_s16  }
  0x4d   : > { %p1018_p12 = scmp.ne.s32.totalorder %s1012_s23, 0 }
  0x4e   : > { %p1019_p4 = scmp.ne.s32.totalorder (!%p1018_p12), %s1007_s18, 0 }
  0x4f   : > { %162 = sbr.rel (%p1018_p12) target bundleno = 347 (0x15b), region = 28 }
  0x56   : > { %719 = dma.done.wait (%p1019_p4), [#allocation3], 128  }
  0x57   : > { %721 = vsyncadd (%p1019_p4), [#allocation3], 4294967168  ;;  %s936_s19 = sand.u32 1, %s736_s10   ;;  %p1020_p5 = scmp.ne.s32.totalorder %s1009_s20, 0 }
  0x58   : > { %s486_s24 = sshll.u32 %s936_s19, 4  ;;  %s169_s3 = scalar_lea.sflag [#allocation6], %s936_s19 }
  0x59   : > { %s172_s4 = scalar_lea.vmem [#allocation5], %s486_s24 }
  0x5a   : > { %723 = dma.done.wait (%p1020_p5), %s169_s3, 256  }
  0x5b   : > { %725 = vsyncadd (%p1020_p5), %s169_s3, 4294967040  ;;  %v758_v0 = vmov 0.0|0.0   ;;  %vm759_vm0 = vmmov 0   ;;  %v760_v1 = vmov 0.0   ;;  %vm197_vm1 = vcmask 261120   ;;  %v194_v2 = vld [vmem:[%s172_s4] sm:$0xff] }
  0x5c   : > { %523 = vmatprep.subr.bf16.mxu1 %v758_v0  ;;  %516 = vmatprep.mubr.msk.f32.mxu1 %vm759_vm0, %v760_v1  ;;  %v195_v3 = vld [vmem:[%s172_s4 + $0x8] sm:$0xff]  ;;  %v277_v4 = vmul.f32 %v194_v2, %v194_v2  ;;  %vm521_vm2 = vmpackc.low %vm197_vm1, %vm197_vm1  ;;  %v761_v9 = vmov 1.0   ;;  %v360_v15 = vlaneseq  ;;  %s487_s18 = sshll.u32 %s936_s19, 3  ;;  %s495_s20 = sshll.u32 %s744_s12, 7  ;;  %vm365_vm3 = vcmask 130048  }
  0x5d   : > { %519 = vmatprep.subr.bf16.mxu0 %v758_v0  ;;  %509 = vmatprep.mubr.msk.f32.mxu0 %vm759_vm0, %v760_v1  ;;  %v278_v5 = vmul.f32 %v195_v3, %v195_v3  ;;  %v520_v6 = vpack.c.bf16 %v195_v3, %v194_v2  ;;  %v196_v8 = vld [vmem:[#allocation2] sm:$0xff]  ;;  %s192_s23 = scalar_lea.vmem [#allocation7], %s487_s18  ;;  %s949_s29 = scalar_lea.hbm %s1000_s2, %s495_s20 }
  0x5e   : > { %v361_v16 = vshrl.u32 %v360_v15, 7  ;;  %s382_s26 = sshll.u32 %s192_s23, 4  ;;  %s368_s5 = scalar_lea.sflag [#allocation4], %s936_s19  ;;  %s951_s26 = int_to_ptr.vmem [resolvable:$true] %s382_s26 }
  0x5f   : > { %v524_v7 = vpack.c.bf16 %v278_v5, %v277_v4  ;;  %522 = vmatpush3.bf16.xpose.msk.msra.mxu0 %vm521_vm2, %v520_v6  ;;  %s666_s17 = scalar_lea.vmem %s951_s26, 128  ;;  %p1021_p10 = scmp.ne.s32.totalorder %s1010_s21, 0 }
  0x60   : > { %v362_v17 = vsub.s32 0, %v361_v16  ;;  %p667_p8 = scmp.ne.s32.totalorder %s951_s26, %s666_s17  ;;  %s762_s12 = smov [#allocation7]  }
  0x61   : > { %526 = vmatpush3.bf16.xpose.msk.msra.mxu1 %vm521_vm2, %v524_v7  ;;  %s670_s30 = sshll.u32 %s762_s12, 4  ;;  %s671_s30 = int_to_ptr.vmem [resolvable:$false] %s670_s30 }
  0x62   : > { %p668_p11 = pnand %p667_p8, %p1021_p10  ;;  %s672_s27 = scalar_lea.vmem %s671_s30, 256 }
  0x63   : > { %p673_p0 = scmp.lt.s32.totalorder %s951_s26, %s671_s30  ;;  %p674_p9 = scmp.lt.s32.totalorder %s672_s27, %s666_s17 }
  0x64   : > { %p669_p1 = pneg %p668_p11 }
  0x65   : > { %p675_p3 = por %p674_p9, %p673_p0 }
  0x66   : > { %510 = vmatmul.mubr.msk.f32.vlgmr.msra.gmra.mrb[0].mxu0 %vm197_vm1, %v196_v8 }
  0x67   : > { %p676_p7 = pnand %p675_p3, %p669_p1 }
  0x68   : > { %517 = vmatmul.mubr.msk.f32.vlgmr.msra.gmra.mrb[0].mxu1 %vm197_vm1, %v761_v9 }
 0x139   : > { %v273_v10 = vpop.f32.mrb[0].mxu0 }
 0x13a   : > { %v511_v11 = vpop.f32.mrb[1].mxu0 }
 0x13b   : > { %v354_v12 = vpop.f32.mrb[0].mxu1 }
 0x13c   : > { %v358_v13 = vmax.f32 %v354_v12, 1e-24  ;;  %v518_v14 = vpop.f32.mrb[1].mxu1 }
 0x13e   : > { %606 = vrsqrt.f32 %v358_v13 }
 0x148   : > { %v607_v18 = vpop.eup %606 }
 0x149   : > { %v363_v19 = vrot.slane %v607_v18, %v362_v17 }
 0x14b   : > { %v364_v20 = vmul.f32 %v363_v19, %v273_v10 }
 0x14d   : > { %366 = vst.msk [vmem:[%s192_s23] sm:$0xff] %vm365_vm3, %v364_v20 }
 0x14e   : > { %679 = shalt.err (!%p676_p7)
}
 0x14f   : > { %s680_s6 = scalar_lea.hbm %s949_s29, 128  ;;  %s684_s19 = scalar_lea.hbm %s1000_s2, 256 }
 0x150   : > { %p681_p13 = scmp.ne.s32.totalorder %s949_s29, %s680_s6  ;;  %p685_p12 = scmp.lt.u32.totalorder %s949_s29, %s1000_s2 }
 0x151   : > { %p686_p4 = scmp.lt.u32.totalorder %s684_s19, %s680_s6  ;;  %p688_p8 = scmp.lt.u32.totalorder %s680_s6, %s949_s29 }
 0x152   : > { %p682_p2 = pnand %p681_p13, %p1021_p10 }
 0x153   : > { %p687_p5 = por %p686_p4, %p685_p12 }
 0x154   : > { %p683_p6 = pneg %p682_p2 }
 0x155   : > { %p689_p11 = por %p688_p8, %p687_p5 }
 0x157   : > { %p690_p1 = pnand %p689_p11, %p683_p6 }
 0x159   : > { %693 = shalt.err (!%p690_p1)
}
 0x15a   : > { %533 = dma.vmem_to_hbm [thread:$0]  (%p1021_p10), %s951_s26, 128, %s949_s29, %s368_s5  }
 0x15b PF: > { %s394_s4 = sand.u32 1, %s732_s9   ;;  %p1022_p0 = scmp.ne.s32.totalorder %s1011_s22, 0 }
 0x15c   : > { %p1023_p9 = scmp.ge.s32.totalorder %s752_s14, 2  ;;  %s395_s18 = scalar_lea.sflag [#allocation4], %s394_s4 }
 0x15e   : > { %p544_p3 = pnand %p1023_p9, %p1022_p0 }
 0x160   : > { %727 = dma.done.wait (!%p544_p3), %s395_s18, 128  }
 0x161   : > { %729 = vsyncadd (!%p544_p3), %s395_s18, 4294967168  ;;  %s19_s14 = sadd.s32 1, %s752_s14   ;;  %s1024_s9 = smov %s736_s10 }
 0x162   : > { %p16_p7 = scmp.ge.s32.totalorder %s19_s14, 4   ;;  %s1025_s10 = smov %s740_s11 }
 0x163   : > { %s1026_s11 = smov %s897_s25  ;;  %s1027_s12 = smov %s748_s13 }
 0x164   : > { %s1028_s13 = smov %s1030_s28  ;;  %18 = sbr.rel (!%p16_p7) target bundleno = 7 (0x7), region = 78 }
 0x16b   :  { %400 = vsyncpa [#allocation3], 1 }
 0x16c   :  { %402 = vsyncpa [#allocation3 + $0x1], 1 }
 0x16d   :  { %403 = vsyncpa [#allocation6], 1 }
 0x16e   :  { %405 = vsyncpa [#allocation6 + $0x1], 1 }
 0x16f   :  { %406 = vsyncpa [#allocation4], 1 }
 0x170   :  { %408 = vsyncpa [#allocation4 + $0x1], 1 }

</bundles_post_ra>
